<compile_context>
chip_gen: v6e
topology: v6e:2x2x1
jax: 0.10.0
libtpu: 0.0.40
codegen_flags: <defaults>
</compile_context>

<pallas_src>
import jax
import jax.numpy as jnp
from jax.experimental import pallas as pl
from jax.experimental.pallas import tpu as pltpu


def _round_up(x, m):
    return ((x + m - 1) // m) * m


# VMEM used per grid step, per batch row (bytes), assuming the compiler
# materializes the (tb, H) intermediates in 128-lane-padded tiles:
#   2x double-buffered f32 x tile + bf16 x copy + f32 h1, h2 + bf16 h1 copy.
_VMEM_TILE_BUDGET = 24 * 1024 * 1024  # headroom under the 40 MiB limit below


def _auto_tile_b(D, H):
    d_lanes = _round_up(max(D, 1), 128)
    h_lanes = _round_up(max(H, 1), 128)
    per_row = 2 * D * 4 + d_lanes * 2 + 2 * h_lanes * 4 + h_lanes * 2
    tb = _VMEM_TILE_BUDGET // per_row
    return max(256, min(tb, 32768))


def _value_net_kernel(x_ref, w1_ref, b1_ref, w2_ref, b2_ref, w3_ref, b3_ref,
                      o_ref):
    """Fused 3-layer MLP forward for one batch tile.

    x_ref : (TB, D)  f32   -- batch tile (pipelined over the grid)
    w1    : (D, H)   bf16  -- VMEM-resident (constant index_map)
    b1    : (1, H)   f32
    w2    : (H, H)   bf16
    b2    : (1, H)   f32
    w3    : (1, H)   f32   -- final layer as a row (VPU reduce, not MXU)
    b3    : (1, 1)   f32   -- SMEM scalar
    o_ref : (1, TB)  f32   -- lane-dense output row for this tile
    """
    # Cast to bf16 in-kernel (VPU); feeds the MXU at native rate without an
    # extra wrapper-side HBM pass over x.
    x = x_ref[...].astype(jnp.bfloat16)

    # Layer 1: MXU matmul (bf16 operands, f32 accumulate); bias + tanh in f32
    # (safe on v5e; EUP handles tanh on all generations).
    h1 = jnp.dot(x, w1_ref[...], preferred_element_type=jnp.float32)
    h1 = jnp.tanh(h1 + b1_ref[...])

    # Layer 2.
    h2 = jnp.dot(h1.astype(jnp.bfloat16), w2_ref[...],
                 preferred_element_type=jnp.float32)
    h2 = jnp.tanh(h2 + b2_ref[...])

    # Layer 3 (out_features == 1): VPU multiply + cross-lane reduce (XLU).
    # Result is rank-1 (TB,) and is stored lane-dense into the (1, TB) block,
    # avoiding TB/8 masked column stores per step.
    out = jnp.sum(h2 * w3_ref[...], axis=-1) + b3_ref[0, 0]
    o_ref[0, :] = out.astype(o_ref.dtype)


def value_network_forward(x, params, *, tile_b=None,
                          vmem_limit_bytes=40 * 1024 * 1024):
    """x: (B, input_dim) float32. Returns (B, 1) float32."""
    w1, b1, w2, b2, w3, b3 = params
    B, D = x.shape
    H = w1.shape[1]

    if tile_b is None:
        tile_b = _auto_tile_b(D, H)
    # Keep at least 2 grid steps for large batches so the "parallel" grid axis
    # can actually shard across v7x's two TensorCores.
    if B >= 4096:
        tile_b = min(tile_b, _round_up((B + 1) // 2, 16))
    # Multiple of 16 (bf16 packs 16 rows per sublane tile).
    tb = min(_round_up(tile_b, 16), _round_up(B, 16))
    num_tiles = pl.cdiv(B, tb)

    # Weights are tiny and DMA'd once (constant index_maps); casting them in
    # the wrapper is negligible.  x itself stays f32 (no wrapper cast).
    w1_bf16 = w1.astype(jnp.bfloat16)
    w2_bf16 = w2.astype(jnp.bfloat16)
    b1_row = b1.reshape(1, H).astype(jnp.float32)
    b2_row = b2.reshape(1, H).astype(jnp.float32)
    w3_row = jnp.transpose(w3).astype(jnp.float32)   # (1, H)
    b3_s = b3.reshape(1, 1).astype(jnp.float32)

    def const(shape):
        return pl.BlockSpec(shape, lambda i: tuple(0 for _ in shape))

    cost = pl.CostEstimate(
        flops=2 * B * (D * H + H * H + H),
        transcendentals=2 * B * H,
        bytes_accessed=(B * D * 4 + B * 4
                        + (D * H + H * H) * 2 + (3 * H + 1) * 4),
    )

    out_rows = pl.pallas_call(
        _value_net_kernel,
        out_shape=jax.ShapeDtypeStruct((num_tiles, tb), jnp.float32),
        grid=(num_tiles,),
        in_specs=[
            pl.BlockSpec((tb, D), lambda i: (i, 0)),             # x (tiled, f32)
            const((D, H)), const((1, H)),                        # w1, b1
            const((H, H)), const((1, H)),                        # w2, b2
            const((1, H)),                                       # w3 row
            pl.BlockSpec(memory_space=pltpu.MemorySpace.SMEM),   # b3 scalar
        ],
        out_specs=pl.BlockSpec((1, tb), lambda i: (i, 0)),       # lane-dense row
        compiler_params=pltpu.CompilerParams(
            dimension_semantics=("parallel",),
            vmem_limit_bytes=vmem_limit_bytes),
        cost_estimate=cost,
    )(x, w1_bf16, b1_row, w2_bf16, b2_row, w3_row, b3_s)

    # (num_tiles, tb) lane-dense rows -> (B, 1); padded tail entries sliced off.
    return out_rows.reshape(num_tiles * tb)[:B].reshape(B, 1)


def init_params(key, input_dim, hidden=64):
    """Mimics PyTorch Linear default init (uniform +-1/sqrt(fan_in))."""
    ks = jax.random.split(key, 6)

    def lin(kw, kb, fan_in, fan_out):
        bound = 1.0 / jnp.sqrt(fan_in)
        w = jax.random.uniform(kw, (fan_in, fan_out), jnp.float32, -bound, bound)
        b = jax.random.uniform(kb, (1, fan_out), jnp.float32, -bound, bound)
        return w, b

    w1, b1 = lin(ks[0], ks[1], input_dim, hidden)
    w2, b2 = lin(ks[2], ks[3], hidden, hidden)
    w3, b3 = lin(ks[4], ks[5], hidden, 1)
    return (w1, b1, w2, b2, w3, b3)


def reference_forward(x, params):
    w1, b1, w2, b2, w3, b3 = params
    h1 = jnp.tanh(x @ w1 + b1)
    h2 = jnp.tanh(h1 @ w2 + b2)
    return h2 @ w3 + b3


if __name__ == "__main__":
    key = jax.random.PRNGKey(0)
    k_x, k_p, k_x2 = jax.random.split(key, 3)

    # Small deterministic check at spec-consistent shapes.
    batch, input_dim = 8, 32
    x = jax.random.normal(k_x, (batch, input_dim), dtype=jnp.float32)
    params = init_params(k_p, input_dim)

    out = jax.block_until_ready(value_network_forward(x, params))
    ref = reference_forward(x, params)  # pure f32 reference
    assert out.shape == (batch, 1)
    # bf16 MXU operands -> tolerance loosened vs. the f32 reference.
    assert jnp.allclose(out, ref, atol=3e-2, rtol=3e-2), "mismatch vs reference (small)"

    # Multi-tile check: exercises the batch grid, lane-dense output rows and a
    # padded last tile (B not a multiple of tile_b).
    batch2 = 4100
    x2 = jax.random.normal(k_x2, (batch2, input_dim), dtype=jnp.float32)
    out2 = jax.block_until_ready(value_network_forward(x2, params, tile_b=1024))
    ref2 = reference_forward(x2, params)
    assert out2.shape == (batch2, 1)
    assert jnp.allclose(out2, ref2, atol=3e-2, rtol=3e-2), "mismatch vs reference (tiled)"

    print("KERNEL_OK")
</pallas_src>

<mosaic_0001>
module attributes {stable_mosaic.version = 11 : i64} {
  func.func @_value_net_kernel(%arg0: i32, %arg1: memref<16x32xf32, #tpu.memory_space<vmem>>, %arg2: memref<32x64xbf16, #tpu.memory_space<vmem>>, %arg3: memref<1x64xf32, #tpu.memory_space<vmem>>, %arg4: memref<64x64xbf16, #tpu.memory_space<vmem>>, %arg5: memref<1x64xf32, #tpu.memory_space<vmem>>, %arg6: memref<1x64xf32, #tpu.memory_space<vmem>>, %arg7: memref<1x1xf32, #tpu.memory_space<smem>>, %arg8: memref<1x16xf32, #tpu.memory_space<vmem>>) attributes {dimension_semantics = [#tpu.dimension_semantics<parallel>], iteration_bounds = array<i64: 1>, scalar_prefetch = 0 : i64, scratch_operands = 0 : i64, tpu.core_type = #tpu.core_type<tc>, window_params = [{transform_indices = @transform_0, window_bounds = array<i64: 16, 32>}, {pipeline_mode = #tpu.pipeline_mode<synchronous>, transform_indices = @transform_1, window_bounds = array<i64: 32, 64>}, {pipeline_mode = #tpu.pipeline_mode<synchronous>, transform_indices = @transform_2, window_bounds = array<i64: 1, 64>}, {pipeline_mode = #tpu.pipeline_mode<synchronous>, transform_indices = @transform_3, window_bounds = array<i64: 64, 64>}, {pipeline_mode = #tpu.pipeline_mode<synchronous>, transform_indices = @transform_4, window_bounds = array<i64: 1, 64>}, {pipeline_mode = #tpu.pipeline_mode<synchronous>, transform_indices = @transform_5, window_bounds = array<i64: 1, 64>}, {transform_indices = @transform_6, window_bounds = array<i64: 1, 1>}, {transform_indices = @transform_7, window_bounds = array<i64: 1, 16>}]} {
    %c0 = arith.constant 0 : index
    %c0_0 = arith.constant 0 : index
    %0 = vector.load %arg1[%c0, %c0_0] : memref<16x32xf32, #tpu.memory_space<vmem>>, vector<16x32xf32>
    %1 = arith.truncf %0 : vector<16x32xf32> to vector<16x32xbf16>
    %c0_1 = arith.constant 0 : index
    %c0_2 = arith.constant 0 : index
    %2 = vector.load %arg2[%c0_1, %c0_2] : memref<32x64xbf16, #tpu.memory_space<vmem>>, vector<32x64xbf16>
    %cst = arith.constant dense<0.000000e+00> : vector<16x64xf32>
    %3 = tpu.matmul %1, %2, %cst {dimension_numbers = #tpu.dot_dimension_numbers<[1], [0], [0], [1], [0, 0, 1, 1], [], []>} : vector<16x32xbf16>, vector<32x64xbf16>, vector<16x64xf32> -> vector<16x64xf32>
    %c0_3 = arith.constant 0 : index
    %c0_4 = arith.constant 0 : index
    %4 = vector.load %arg3[%c0_3, %c0_4] : memref<1x64xf32, #tpu.memory_space<vmem>>, vector<1x64xf32>
    %5 = vector.broadcast %4 : vector<1x64xf32> to vector<16x64xf32>
    %6 = arith.addf %3, %5 : vector<16x64xf32>
    %7 = math.tanh %6 : vector<16x64xf32>
    %8 = arith.truncf %7 : vector<16x64xf32> to vector<16x64xbf16>
    %c0_5 = arith.constant 0 : index
    %c0_6 = arith.constant 0 : index
    %9 = vector.load %arg4[%c0_5, %c0_6] : memref<64x64xbf16, #tpu.memory_space<vmem>>, vector<64x64xbf16>
    %cst_7 = arith.constant dense<0.000000e+00> : vector<16x64xf32>
    %10 = tpu.matmul %8, %9, %cst_7 {dimension_numbers = #tpu.dot_dimension_numbers<[1], [0], [0], [1], [0, 0, 1, 1], [], []>} : vector<16x64xbf16>, vector<64x64xbf16>, vector<16x64xf32> -> vector<16x64xf32>
    %c0_8 = arith.constant 0 : index
    %c0_9 = arith.constant 0 : index
    %11 = vector.load %arg5[%c0_8, %c0_9] : memref<1x64xf32, #tpu.memory_space<vmem>>, vector<1x64xf32>
    %12 = vector.broadcast %11 : vector<1x64xf32> to vector<16x64xf32>
    %13 = arith.addf %10, %12 : vector<16x64xf32>
    %14 = math.tanh %13 : vector<16x64xf32>
    %c0_10 = arith.constant 0 : index
    %c0_11 = arith.constant 0 : index
    %15 = vector.load %arg6[%c0_10, %c0_11] : memref<1x64xf32, #tpu.memory_space<vmem>>, vector<1x64xf32>
    %16 = vector.broadcast %15 : vector<1x64xf32> to vector<16x64xf32>
    %17 = arith.mulf %14, %16 : vector<16x64xf32>
    %cst_12 = arith.constant dense<0.000000e+00> : vector<16xf32>
    %18 = vector.multi_reduction <add>, %17, %cst_12 [1] : vector<16x64xf32> to vector<16xf32>
    %c0_13 = arith.constant 0 : index
    %c0_14 = arith.constant 0 : index
    %19 = memref.load %arg7[%c0_13, %c0_14] : memref<1x1xf32, #tpu.memory_space<smem>>
    %20 = vector.broadcast %19 : f32 to vector<16xf32>
    %21 = arith.addf %18, %20 : vector<16xf32>
    %c0_15 = arith.constant 0 : index
    %c0_16 = arith.constant 0 : index
    %22 = vector.load %arg8[%c0_15, %c0_16] : memref<1x16xf32, #tpu.memory_space<vmem>>, vector<1x16xf32>
    %23 = vector.shape_cast %22 : vector<1x16xf32> to vector<16xf32>
    %24 = vector.shape_cast %21 : vector<16xf32> to vector<1x16xf32>
    tpu.vector_store %arg8[%c0_15, %c0_16], %24 {strides = array<i32>} : memref<1x16xf32, #tpu.memory_space<vmem>>, vector<1x16xf32>,
    return
  }
  func.func @transform_0(%arg0: i32) -> (i32, i32) {
    %c0_i32 = arith.constant 0 : i32
    %c0_i32_0 = arith.constant 0 : i32
    return %arg0, %c0_i32 : i32, i32
  }
  func.func @transform_1(%arg0: i32) -> (i32, i32) {
    %c0_i32 = arith.constant 0 : i32
    %c0_i32_0 = arith.constant 0 : i32
    %c0_i32_1 = arith.constant 0 : i32
    return %c0_i32, %c0_i32_0 : i32, i32
  }
  func.func @transform_2(%arg0: i32) -> (i32, i32) {
    %c0_i32 = arith.constant 0 : i32
    %c0_i32_0 = arith.constant 0 : i32
    %c0_i32_1 = arith.constant 0 : i32
    return %c0_i32, %c0_i32_0 : i32, i32
  }
  func.func @transform_3(%arg0: i32) -> (i32, i32) {
    %c0_i32 = arith.constant 0 : i32
    %c0_i32_0 = arith.constant 0 : i32
    %c0_i32_1 = arith.constant 0 : i32
    return %c0_i32, %c0_i32_0 : i32, i32
  }
  func.func @transform_4(%arg0: i32) -> (i32, i32) {
    %c0_i32 = arith.constant 0 : i32
    %c0_i32_0 = arith.constant 0 : i32
    %c0_i32_1 = arith.constant 0 : i32
    return %c0_i32, %c0_i32_0 : i32, i32
  }
  func.func @transform_5(%arg0: i32) -> (i32, i32) {
    %c0_i32 = arith.constant 0 : i32
    %c0_i32_0 = arith.constant 0 : i32
    %c0_i32_1 = arith.constant 0 : i32
    return %c0_i32, %c0_i32_0 : i32, i32
  }
  func.func @transform_6(%arg0: i32) -> (i32, i32) {
    %c0_i32 = arith.constant 0 : i32
    %c0_i32_0 = arith.constant 0 : i32
    %c0_i32_1 = arith.constant 0 : i32
    return %c0_i32, %c0_i32_0 : i32, i32
  }
  func.func @transform_7(%arg0: i32) -> (i32, i32) {
    %c0_i32 = arith.constant 0 : i32
    %c0_i32_0 = arith.constant 0 : i32
    return %arg0, %c0_i32 : i32, i32
  }
}

</mosaic_0001>

<bundles_post_ra>
// kernel: tpu_custom_call.1
= control target key start
LH: loop header
LB: loop body
LE: loop exit
PB: predicated region body
PF: predicated region fallthrough
CT: control target
= control target key end

     0   :  { %13 = vsyncpa [#allocation4], 0  ;;  %s515_s0 = inlined_call_operand.hbm [shape: f32[8,32], index: 0, kind: input, shape index: {}]   ;;  %s516_s1 = inlined_call_operand.hbm [shape: bf16[32,64], index: 1, kind: input, shape index: {}]   ;;  %s517_s2 = inlined_call_operand.vmem [shape: f32[1,64], index: 2, kind: input, shape index: {}]   ;;  %s518_s3 = inlined_call_operand.hbm [shape: bf16[64,64], index: 3, kind: input, shape index: {}]   ;;  %s519_s4 = inlined_call_operand.vmem [shape: f32[1,64], index: 4, kind: input, shape index: {}]   ;;  %s520_s5 = inlined_call_operand.vmem [shape: f32[1,64], index: 5, kind: input, shape index: {}]   ;;  %s521_s6 = inlined_call_operand.<no memory space> [shape: f32[1,1], index: 6, kind: input, shape index: {}]   ;;  %s522_s7 = inlined_call_operand.hbm [shape: f32[1,16], index: 7, kind: output, shape index: {}]  }
   0x1   :  { %14 = vsyncpa [#allocation7], 0 }
   0x2   :  { %15 = vsyncpa [#allocation5], 0 }
   0x3   :  { %20 = vsyncadd [#allocation4], 128  ;;  %s432_s24 = smov [#allocation6]  }
   0x4   :  { %s33_s25 = sshll.u32 %s432_s24, 4  ;;  %s34_s25 = int_to_ptr.vmem [resolvable:$true] %s33_s25 }
   0x5   :  { %s354_s26 = scalar_lea.vmem %s34_s25, 256  ;;  %p359_p1 = scmp.lt.s32.totalorder %s34_s25, %s34_s25 }
   0x6   :  { %p355_p0 = scmp.ne.s32.totalorder %s34_s25, %s354_s26  ;;  %p360_p2 = scmp.lt.s32.totalorder %s354_s26, %s354_s26 }
   0x8   :  { %p361_p3 = por %p360_p2, %p359_p1 }
   0xa   :  { %p362_p4 = pnand %p361_p3, %p355_p0 }
   0xc   :  { %365 = shalt.err (!%p362_p4)
}
   0xd   :  { %s433_s27 = smov 64   ;;  %s434_s28 = smov 4  }
   0xe   :  { %39 = dma.hbm_to_vmem [thread:$0]  %s516_s1, 256, %s34_s25, [#allocation7], %s433_s27, %s433_s27, %s434_s28  }
   0xf   :  { %s435_s8 = smov [#allocation3]  }
  0x10   :  { %s21_s9 = sshll.u32 %s435_s8, 4  ;;  %s22_s9 = int_to_ptr.vmem [resolvable:$true] %s21_s9 }
  0x11   :  { %s374_s10 = scalar_lea.vmem %s22_s9, 128  ;;  %s378_s11 = scalar_lea.vmem %s22_s9, 256 }
  0x12   :  { %p375_p5 = scmp.ne.s32.totalorder %s22_s9, %s374_s10  ;;  %p379_p6 = scmp.lt.s32.totalorder %s22_s9, %s22_s9 }
  0x13   :  { %p380_p7 = scmp.lt.s32.totalorder %s378_s11, %s374_s10 }
  0x15   :  { %p381_p8 = por %p380_p7, %p379_p6 }
  0x17   :  { %p382_p9 = pnand %p381_p8, %p375_p5 }
  0x19   :  { %385 = shalt.err (!%p382_p9)
}
  0x1a   :  { %s436_s12 = smov 128   ;;  %s437_s13 = smov 8  }
  0x1b   :  { %27 = dma.hbm_to_vmem [thread:$0]  %s515_s0, 128, %s22_s9, [#allocation4], %s436_s12, %s436_s12, %s437_s13  }
  0x1c   :  { %s438_s16 = smov [#allocation8]  }
  0x1d   :  { %s47_s17 = sshll.u32 %s438_s16, 4  ;;  %s48_s17 = int_to_ptr.vmem [resolvable:$true] %s47_s17 }
  0x1e   :  { %s394_s1 = scalar_lea.vmem %s48_s17, 512  ;;  %p399_p11 = scmp.lt.s32.totalorder %s48_s17, %s48_s17 }
  0x1f   :  { %p395_p10 = scmp.ne.s32.totalorder %s48_s17, %s394_s1  ;;  %p400_p12 = scmp.lt.s32.totalorder %s394_s1, %s394_s1 }
  0x21   :  { %p401_p13 = por %p400_p12, %p399_p11 }
  0x23   :  { %p402_p0 = pnand %p401_p13, %p395_p10 }
  0x25   :  { %405 = shalt.err (!%p402_p0)
}
  0x26   :  { %53 = dma.hbm_to_vmem [thread:$0]  %s518_s3, 512, %s48_s17, [#allocation7], %s433_s27, %s433_s27, %s434_s28  }
  0x27   :  { %426 = dma.done.wait [#allocation4], 256  }
  0x28   :  { %427 = vsyncadd [#allocation4], 4294967040 }
  0x29   :  { %428 = dma.done.wait [#allocation7], 768  }
  0x2a   :  { %429 = vsyncadd [#allocation7], 4294966528  ;;  %v439_v0 = vmov 0.0   ;;  %vm440_vm0 = vmmov 0   ;;  %v332_v1 = vld [vmem:[#allocation6 + $0x8] sm:$0xff]   ;;  %v333_v2 = vld [vmem:[#allocation6] sm:$0xff]   ;;  %v251_v34 = vlaneseq  ;;  %v246_v38 = vstv %s521_s6 }
  0x2b   :  { %302 = vmatprep.subr.bf16.mxu0 %v439_v0  ;;  %306 = vmatprep.mubr.msk.bf16.mxu0 %vm440_vm0, %v439_v0  ;;  %v70_v3 = vld [vmem:[#allocation3] sm:$0xff]  ;;  %v71_v4 = vld [vmem:[#allocation3 + $0x8] sm:$0xff]  ;;  %vm96_vm1 = vcmask 261120   ;;  %v334_v6 = vld [vmem:[#allocation8 + $0x18] sm:$0xff]   ;;  %vm183_vm2 = vcmask 523264   ;;  %vm262_vm3 = vcmask 130112  }
  0x2c   :  { %310 = vmatprep.subr.bf16.mxu1 %v439_v0  ;;  %318 = vmatprep.mubr.msk.bf16.mxu1 %vm440_vm0, %v439_v0  ;;  %v72_v5 = vpack.c.bf16 %v71_v4, %v70_v3  ;;  %v335_v7 = vld [vmem:[#allocation8 + $0x10] sm:$0xff]   ;;  %v336_v8 = vld [vmem:[#allocation8 + $0x8] sm:$0xff]   ;;  %v337_v9 = vld [vmem:[#allocation8] sm:$0xff]   ;;  %v252_v35 = vand.u32 127, %v251_v34  ;;  %v254_v36 = vshrl.u32 %v251_v34, 7  ;;  %vm265_vm4 = vcmask 122880  }
  0x2d   :  { %303 = vmatpush3.bf16.msra.mxu0 %v332_v1  ;;  %311 = vmatpush3.bf16.msra.mxu1 %v334_v6  ;;  %v283_v10 = vld [vmem:[%s517_s2] ss:$0 sm:$0xff] }
  0x2e   :  { %304 = vmatprep.subr.bf16.mxu0 %v439_v0  ;;  %312 = vmatprep.subr.bf16.mxu1 %v439_v0  ;;  %v287_v20 = vld [vmem:[%s519_s4] ss:$0 sm:$0xff]  ;;  %v257_v37 = vadd.s32 4294967288, %v252_v35  ;;  %v255_v40 = vsub.s32 %v252_v35, %v254_v36 }
  0x2f   :  { %v293_v27 = vld [vmem:[%s520_s5] ss:$0 sm:$0xff]  ;;  %s441_s5 = smov [#allocation9]  }
  0x30   :  { %v260_v42 = vsub.s32 %v257_v37, %v254_v36  ;;  %s273_s24 = sshll.u32 %s441_s5, 4  ;;  %s274_s24 = int_to_ptr.vmem [resolvable:$true] %s273_s24 }
  0x31   :  { %305 = vmatpush3.bf16.msra.mxu0 %v333_v2  ;;  %313 = vmatpush3.bf16.msra.mxu1 %v335_v7  ;;  %s406_s25 = scalar_lea.vmem %s274_s24, 16  ;;  %s410_s26 = scalar_lea.vmem %s274_s24, 32 }
  0x32   :  { %314 = vmatprep.subr.bf16.mxu1 %v439_v0  ;;  %p407_p1 = scmp.ne.s32.totalorder %s274_s24, %s406_s25  ;;  %p411_p2 = scmp.lt.s32.totalorder %s274_s24, %s274_s24 }
  0x33   :  { %p412_p3 = scmp.lt.s32.totalorder %s410_s26, %s406_s25 }
  0x34   :  { %307 = vmatmul.mubr.msk.bf16.vlgmr.msra.gmra.mxu0 %vm96_vm1, %v72_v5 }
  0x35   :  { %315 = vmatpush3.bf16.msra.mxu1 %v336_v8  ;;  %p413_p4 = por %p412_p3, %p411_p2 }
  0x36   :  { %316 = vmatprep.subr.bf16.mxu1 %v439_v0 }
  0x37   :  { %p414_p5 = pnand %p413_p4, %p407_p1 }
  0x39   :  { %317 = vmatpush3.bf16.msra.mxu1 %v337_v9 }
  0xf4   :  { %v134_v11 = vpop.f32.mrf.mxu0 }
  0xf5   :  { %v135_v12 = vadd.f32 %v283_v10, %v134_v11 }
  0xf6   :  { %v308_v13 = vpop.f32.mrf.mxu0 }
  0xf7   :  { %338 = vtanh.f32 %v135_v12 }
  0xf8   :  { %v137_v14 = vpop.f32.mrf.mxu0 }
  0xf9   :  { %v138_v15 = vadd.f32 %v283_v10, %v137_v14 }
  0xfa   :  { %v309_v16 = vpop.f32.mrf.mxu0 }
  0xfb   :  { %340 = vtanh.f32 %v138_v15 }
 0x104   :  { %v339_v17 = vpop.eup %338 }
 0x108   :  { %v341_v18 = vpop.eup %340 }
 0x109   :  { %v143_v19 = vpack.c.bf16 %v341_v18, %v339_v17 }
 0x10b   :  { %319 = vmatmul.mubr.msk.bf16.vlgmr.msra.gmra.mxu1 %vm183_vm2, %v143_v19 }
 0x1cb   :  { %v221_v21 = vpop.f32.mrf.mxu1 }
 0x1cc   :  { %v222_v22 = vadd.f32 %v287_v20, %v221_v21 }
 0x1cd   :  { %v320_v23 = vpop.f32.mrf.mxu1 }
 0x1ce   :  { %342 = vtanh.f32 %v222_v22 }
 0x1cf   :  { %v224_v24 = vpop.f32.mrf.mxu1 }
 0x1d0   :  { %v225_v25 = vadd.f32 %v287_v20, %v224_v24 }
 0x1d1   :  { %v321_v26 = vpop.f32.mrf.mxu1 }
 0x1d2   :  { %344 = vtanh.f32 %v225_v25 }
 0x1db   :  { %v343_v28 = vpop.eup %342 }
 0x1dc   :  { %v237_v29 = vmul.f32 %v343_v28, %v293_v27 }
 0x1de   :  { %v239_v30 = vsel %vm183_vm2, %v237_v29, 0.0 }
 0x1df   :  { %v345_v31 = vpop.eup %344  ;;  %240 = vadd.xlane.f32.xlu0 %v239_v30 }
 0x1e0   :  { %v238_v32 = vmul.f32 %v345_v31, %v293_v27 }
 0x1e2   :  { %v242_v33 = vsel %vm183_vm2, %v238_v32, 0.0 }
 0x1e3   :  { %243 = vadd.xlane.f32.xlu0 %v242_v33 }
 0x268   :  { %v241_v39 = vpop.xlane.xlu0 %240 }
 0x269   :  { %v247_v41 = vadd.f32 %v246_v38, %v241_v39 }
 0x26b   :  { %v256_v45 = vrot.slane %v247_v41, %v255_v40 }
 0x26c   :  { %v244_v43 = vpop.xlane.xlu0 %243 }
 0x26d   :  { %v248_v44 = vadd.f32 %v246_v38, %v244_v43 }
 0x26f   :  { %v261_v46 = vrot.slane %v248_v44, %v260_v42 }
 0x271   :  { %v263_v47 = vsel %vm262_vm3, %v261_v46, %v256_v45 }
 0x272   :  { %266 = vst.msk [vmem:[#allocation9] sm:$0x1] %vm265_vm4, %v263_v47 }
 0x273   :  { %417 = shalt.err (!%p414_p5)
}
 0x274   :  { %276 = dma.vmem_to_hbm [thread:$0]  %s274_s24, 16, %s522_s7, [#allocation5]  }
 0x275   :  { %430 = dma.done.wait [#allocation5], 16  }
 0x276   :  { %431 = vsyncadd [#allocation5], 4294967280 }
 0x277   :  { %280 = vsyncpa [#allocation4], 1 }
 0x278   :  { %281 = vsyncpa [#allocation7], 1 }
 0x279   :  { %282 = vsyncpa [#allocation5], 1 }

</bundles_post_ra>
